<compile_context>
chip_gen: v7x
topology: tpu7x:2x2x1
jax: 0.10.0
libtpu: 0.0.40
codegen_flags: <defaults>
</compile_context>

<pallas_src>
import numpy as np
import jax
import jax.numpy as jnp
from jax.experimental import pallas as pl
from jax.experimental.pallas import tpu as pltpu

N_QUBITS = 8
N_CLASS = 3
N_QLAYERS = 1
DIM = 2 ** N_QUBITS           # 256
NCLASS_PAD = 128              # lane-dense padded output width
BATCH = 16                    # small demo batch


# ---------------------------------------------------------------------------
# Glue: build the (input-independent) VQC unitary and helper constant tables.
# ---------------------------------------------------------------------------
def _rx(t):
    c, s = np.cos(t / 2), np.sin(t / 2)
    return np.array([[c, -1j * s], [-1j * s, c]], dtype=np.complex64)


def _ry(t):
    c, s = np.cos(t / 2), np.sin(t / 2)
    return np.array([[c, -s], [s, c]], dtype=np.complex64)


def _rz(t):
    return np.array([[np.exp(-1j * t / 2), 0], [0, np.exp(1j * t / 2)]],
                    dtype=np.complex64)


def _apply_1q(U, g, wire, n):
    # wire 0 = most-significant bit of the state index
    dim = 2 ** n
    left, right = 2 ** wire, 2 ** (n - 1 - wire)
    U4 = U.reshape(left, 2, right, dim)
    U4 = np.einsum("ab,xbyc->xayc", g, U4)
    return U4.reshape(dim, dim)


def _apply_cnot(U, ctrl, tgt, n):
    dim = 2 ** n
    idx = np.arange(dim)
    cbit = (idx >> (n - 1 - ctrl)) & 1
    perm = np.where(cbit == 1, idx ^ (1 << (n - 1 - tgt)), idx)
    return U[perm, :]


def build_vqc_unitary(params, n_qubits, n_qlayers):
    """params: (n_qlayers, 3, n_qubits) rotation angles for RX/RY/RZ."""
    U = np.eye(2 ** n_qubits, dtype=np.complex64)
    for l in range(n_qlayers):
        for w in range(n_qubits):
            U = _apply_1q(U, _rx(params[l, 0, w]), w, n_qubits)
            U = _apply_1q(U, _ry(params[l, 1, w]), w, n_qubits)
            U = _apply_1q(U, _rz(params[l, 2, w]), w, n_qubits)
        for w in range(n_qubits):  # CNOT ring
            U = _apply_cnot(U, w, (w + 1) % n_qubits, n_qubits)
    return U


def bit_table(n_qubits):
    """(n_qubits, 2^n) float table: bit of wire q in basis state s (wire 0 = MSB)."""
    idx = np.arange(2 ** n_qubits)
    bits = np.stack([(idx >> (n_qubits - 1 - q)) & 1 for q in range(n_qubits)], 0)
    return bits.astype(np.float32)


# ---------------------------------------------------------------------------
# Pallas kernel: whole per-sample forward pass for one batch tile.
# ---------------------------------------------------------------------------
def _pca_vqc_kernel(x_ref, cmask_ref, smask_ref, uriT_ref, tail_ref, out_ref):
    x = x_ref[...]                                              # (TB, Q)
    half = jax.nn.sigmoid(x) * jnp.float32(np.pi * 0.25)        # theta/2, theta=sigmoid(x)*pi/2
    log_c = jnp.log(jnp.cos(half))                              # cos(half) in (0.70, 1]: finite
    log_s = jnp.log(jnp.maximum(jnp.sin(half), jnp.float32(1e-30)))   # clamp -> no -inf/NaN

    # Angle-encoded product state in log space, built on the MXU:
    #   log_amps[b, s] = sum_q [(1 - bit_q(s)) * log_c[b,q] + bit_q(s) * log_s[b,q]]
    log_amps = (jnp.dot(log_c, cmask_ref[...], preferred_element_type=jnp.float32)
                + jnp.dot(log_s, smask_ref[...], preferred_element_type=jnp.float32))
    amps = jnp.exp(log_amps)                                    # (TB, S) -- EUP pass

    # One fused MXU pass for the circuit: psi = amps @ [Re(U)^T | Im(U)^T]  -> (TB, 2S)
    psi = jnp.dot(amps, uriT_ref[...], preferred_element_type=jnp.float32)
    s_dim = amps.shape[1]
    psi_r = psi[:, :s_dim]
    psi_i = psi[:, s_dim:]
    probs = psi_r * psi_r + psi_i * psi_i                       # (TB, S)

    # Fused, lane-dense tail: tail = [zsign @ W^T + b | -1e30 padding] of shape (S, 128).
    logits = jnp.dot(probs, tail_ref[...], preferred_element_type=jnp.float32)  # (TB, 128)

    # log_softmax(dim=1); padded lanes hold ~-1e30 so exp underflows to 0 and they
    # do not affect max / logsumexp of the 3 real classes.
    m = jnp.max(logits, axis=-1, keepdims=True)
    z = logits - m
    lse = jnp.log(jnp.sum(jnp.exp(z), axis=-1, keepdims=True))
    out_ref[...] = z - lse


def _round_up(v, m):
    return ((v + m - 1) // m) * m


def _choose_tiling(batch):
    """One grid step on single-TC chips (v5e/v6e); >=2 'parallel' tiles on v7x (2 TCs)."""
    try:
        kind = jax.devices()[0].device_kind.lower()
    except Exception:
        kind = ""
    two_tc = ("v7" in kind) or ("tpu7" in kind) or ("7x" in kind)
    min_tiles = 2 if two_tc else 1
    tile_b = max(8, min(512, _round_up(pl.cdiv(batch, min_tiles), 8)))
    padded = _round_up(batch, tile_b)
    return padded, tile_b


def pca_vqc_forward(x, cmask, smask, uriT, tail, n_class=N_CLASS):
    batch, n_q = x.shape
    padded, tile_b = _choose_tiling(batch)
    if padded != batch:                                         # pad batch to a tile multiple
        x = jnp.pad(x, ((0, padded - batch), (0, 0)))
    n_tiles = padded // tile_b

    out = pl.pallas_call(
        _pca_vqc_kernel,
        out_shape=jax.ShapeDtypeStruct((padded, tail.shape[1]), jnp.float32),
        grid=(n_tiles,),
        in_specs=[
            pl.BlockSpec((tile_b, n_q), lambda i: (i, 0)),      # x: blocked over batch
            # Constant tables: full-array blocks, constant index_map -> VMEM-resident,
            # not re-fetched across grid steps (block index never changes).
            pl.BlockSpec(cmask.shape, lambda i: (0, 0)),
            pl.BlockSpec(smask.shape, lambda i: (0, 0)),
            pl.BlockSpec(uriT.shape, lambda i: (0, 0)),
            pl.BlockSpec(tail.shape, lambda i: (0, 0)),
        ],
        out_specs=pl.BlockSpec((tile_b, tail.shape[1]), lambda i: (i, 0)),
        compiler_params=pltpu.CompilerParams(
            dimension_semantics=("parallel",)),                 # v7x: shard tiles on 2 TCs
    )(x, cmask, smask, uriT, tail)
    return out[:batch, :n_class]


# ---------------------------------------------------------------------------
# Pure-JAX reference for verification (follows the torch module step by step).
# ---------------------------------------------------------------------------
def reference(x, U, W, b, bits):
    theta = jax.nn.sigmoid(x) * (np.pi / 2.0)
    c, s = jnp.cos(theta / 2), jnp.sin(theta / 2)
    factors = jnp.where(bits[None, :, :] == 1.0, s[:, :, None], c[:, :, None])
    amps = jnp.prod(factors, axis=1)                            # (B, S)
    psi = amps.astype(jnp.complex64) @ U.T
    probs = jnp.abs(psi) ** 2
    zsign = 1.0 - 2.0 * bits.T                                  # (S, Q)
    expz = probs @ zsign
    logits = expz @ W.T + b
    return jax.nn.log_softmax(logits, axis=1)


if __name__ == "__main__":
    key = jax.random.PRNGKey(0)
    k_x, k_theta, k_w, k_b = jax.random.split(key, 4)

    # Deterministic "weights"
    circ_params = np.asarray(
        jax.random.uniform(k_theta, (N_QLAYERS, 3, N_QUBITS),
                           minval=0.0, maxval=2.0 * np.pi), dtype=np.float64)
    bound = 1.0 / np.sqrt(N_QUBITS)
    W = jax.random.uniform(k_w, (N_CLASS, N_QUBITS), minval=-bound, maxval=bound,
                           dtype=jnp.float32)
    b = jax.random.uniform(k_b, (N_CLASS,), minval=-bound, maxval=bound,
                           dtype=jnp.float32)

    # Input features (post-PCA), shape (batch, n_qubits)
    x = jax.random.normal(k_x, (BATCH, N_QUBITS), dtype=jnp.float32)

    # Precomputed circuit unitary & fused constant tables
    U_np = build_vqc_unitary(circ_params, N_QUBITS, N_QLAYERS)
    bits_np = bit_table(N_QUBITS)                               # (Q, S)

    smask = jnp.asarray(bits_np)                                # (Q, S): bit == 1 mask
    cmask = jnp.asarray(1.0 - bits_np)                          # (Q, S): bit == 0 mask
    # Fused real|imag transposed unitary: (S, 2S)
    uriT = jnp.asarray(
        np.ascontiguousarray(
            np.concatenate([U_np.real.T, U_np.imag.T], axis=1)), dtype=jnp.float32)
    # Fused, lane-dense tail matrix: [zsign @ W^T + b | -1e30 padding]  -> (S, 128).
    # Bias fold is exact because each row of probs sums to 1 (unitary evolution of a
    # normalized product state); -1e30 padding makes padded logits drop out of softmax.
    zsign_np = (1.0 - 2.0 * bits_np).T                          # (S, Q)
    tail_core = zsign_np @ np.asarray(W).T + np.asarray(b)[None, :]   # (S, C)
    tail_np = np.full((DIM, NCLASS_PAD), -1e30, dtype=np.float32)
    tail_np[:, :N_CLASS] = tail_core
    tail = jnp.asarray(tail_np)                                 # (S, 128)

    out = pca_vqc_forward(x, cmask, smask, uriT, tail)
    out = jax.block_until_ready(out)

    ref = reference(x, jnp.asarray(U_np), W, b, jnp.asarray(bits_np))
    np.testing.assert_allclose(np.asarray(out), np.asarray(ref),
                               atol=1e-3, rtol=1e-3)

    print("KERNEL_OK")
</pallas_src>

<mosaic_0001>
module attributes {stable_mosaic.version = 11 : i64} {
  func.func @_pca_vqc_kernel(%arg0: i32, %arg1: memref<16x8xf32, #tpu.memory_space<vmem>>, %arg2: memref<8x256xf32, #tpu.memory_space<vmem>>, %arg3: memref<8x256xf32, #tpu.memory_space<vmem>>, %arg4: memref<256x512xf32, #tpu.memory_space<vmem>>, %arg5: memref<256x128xf32, #tpu.memory_space<vmem>>, %arg6: memref<16x128xf32, #tpu.memory_space<vmem>>) attributes {dimension_semantics = [#tpu.dimension_semantics<parallel>], iteration_bounds = array<i64: 1>, scalar_prefetch = 0 : i64, scratch_operands = 0 : i64, tpu.core_type = #tpu.core_type<tc>, window_params = [{transform_indices = @transform_0, window_bounds = array<i64: 16, 8>}, {pipeline_mode = #tpu.pipeline_mode<synchronous>, transform_indices = @transform_1, window_bounds = array<i64: 8, 256>}, {pipeline_mode = #tpu.pipeline_mode<synchronous>, transform_indices = @transform_2, window_bounds = array<i64: 8, 256>}, {pipeline_mode = #tpu.pipeline_mode<synchronous>, transform_indices = @transform_3, window_bounds = array<i64: 256, 512>}, {pipeline_mode = #tpu.pipeline_mode<synchronous>, transform_indices = @transform_4, window_bounds = array<i64: 256, 128>}, {transform_indices = @transform_5, window_bounds = array<i64: 16, 128>}]} {
    %c0 = arith.constant 0 : index
    %c0_0 = arith.constant 0 : index
    %0 = vector.load %arg1[%c0, %c0_0] : memref<16x8xf32, #tpu.memory_space<vmem>>, vector<16x8xf32>
    %1 = arith.negf %0 : vector<16x8xf32>
    %2 = math.exp %1 : vector<16x8xf32>
    %cst = arith.constant 1.000000e+00 : f32
    %3 = vector.broadcast %cst : f32 to vector<16x8xf32>
    %4 = arith.addf %3, %2 : vector<16x8xf32>
    %5 = arith.divf %3, %4 : vector<16x8xf32>
    %cst_1 = arith.constant 0.785398185 : f32
    %6 = vector.broadcast %cst_1 : f32 to vector<16x8xf32>
    %7 = arith.mulf %5, %6 : vector<16x8xf32>
    %8 = math.cos %7 : vector<16x8xf32>
    %9 = math.log %8 : vector<16x8xf32>
    %10 = math.sin %7 : vector<16x8xf32>
    %cst_2 = arith.constant 1.000000e-30 : f32
    %11 = vector.broadcast %cst_2 : f32 to vector<16x8xf32>
    %12 = arith.maximumf %10, %11 : vector<16x8xf32>
    %13 = math.log %12 : vector<16x8xf32>
    %c0_3 = arith.constant 0 : index
    %c0_4 = arith.constant 0 : index
    %14 = vector.load %arg2[%c0_3, %c0_4] : memref<8x256xf32, #tpu.memory_space<vmem>>, vector<8x256xf32>
    %cst_5 = arith.constant dense<0.000000e+00> : vector<16x256xf32>
    %15 = tpu.matmul %9, %14, %cst_5 {dimension_numbers = #tpu.dot_dimension_numbers<[1], [0], [0], [1], [0, 0, 1, 1], [], []>} : vector<16x8xf32>, vector<8x256xf32>, vector<16x256xf32> -> vector<16x256xf32>
    %c0_6 = arith.constant 0 : index
    %c0_7 = arith.constant 0 : index
    %16 = vector.load %arg3[%c0_6, %c0_7] : memref<8x256xf32, #tpu.memory_space<vmem>>, vector<8x256xf32>
    %cst_8 = arith.constant dense<0.000000e+00> : vector<16x256xf32>
    %17 = tpu.matmul %13, %16, %cst_8 {dimension_numbers = #tpu.dot_dimension_numbers<[1], [0], [0], [1], [0, 0, 1, 1], [], []>} : vector<16x8xf32>, vector<8x256xf32>, vector<16x256xf32> -> vector<16x256xf32>
    %18 = arith.addf %15, %17 : vector<16x256xf32>
    %19 = math.exp %18 : vector<16x256xf32>
    %c0_9 = arith.constant 0 : index
    %c0_10 = arith.constant 0 : index
    %20 = vector.load %arg4[%c0_9, %c0_10] : memref<256x512xf32, #tpu.memory_space<vmem>>, vector<256x512xf32>
    %cst_11 = arith.constant dense<0.000000e+00> : vector<16x512xf32>
    %21 = tpu.matmul %19, %20, %cst_11 {dimension_numbers = #tpu.dot_dimension_numbers<[1], [0], [0], [1], [0, 0, 1, 1], [], []>} : vector<16x256xf32>, vector<256x512xf32>, vector<16x512xf32> -> vector<16x512xf32>
    %22 = vector.extract_strided_slice %21 {offsets = [0, 0], sizes = [16, 256], strides = [1, 1]} : vector<16x512xf32> to vector<16x256xf32>
    %23 = vector.extract_strided_slice %21 {offsets = [0, 256], sizes = [16, 256], strides = [1, 1]} : vector<16x512xf32> to vector<16x256xf32>
    %24 = arith.mulf %22, %22 : vector<16x256xf32>
    %25 = arith.mulf %23, %23 : vector<16x256xf32>
    %26 = arith.addf %24, %25 : vector<16x256xf32>
    %c0_12 = arith.constant 0 : index
    %c0_13 = arith.constant 0 : index
    %27 = vector.load %arg5[%c0_12, %c0_13] : memref<256x128xf32, #tpu.memory_space<vmem>>, vector<256x128xf32>
    %cst_14 = arith.constant dense<0.000000e+00> : vector<16x128xf32>
    %28 = tpu.matmul %26, %27, %cst_14 {dimension_numbers = #tpu.dot_dimension_numbers<[1], [0], [0], [1], [0, 0, 1, 1], [], []>} : vector<16x256xf32>, vector<256x128xf32>, vector<16x128xf32> -> vector<16x128xf32>
    %cst_15 = arith.constant dense<0xFF800000> : vector<16xf32>
    %29 = vector.multi_reduction <maximumf>, %28, %cst_15 [1] : vector<16x128xf32> to vector<16xf32>
    %30 = vector.shape_cast %29 : vector<16xf32> to vector<16x1xf32>
    %31 = vector.broadcast %30 : vector<16x1xf32> to vector<16x128xf32>
    %32 = arith.subf %28, %31 : vector<16x128xf32>
    %33 = math.exp %32 : vector<16x128xf32>
    %cst_16 = arith.constant dense<0.000000e+00> : vector<16xf32>
    %34 = vector.multi_reduction <add>, %33, %cst_16 [1] : vector<16x128xf32> to vector<16xf32>
    %35 = vector.shape_cast %34 : vector<16xf32> to vector<16x1xf32>
    %36 = math.log %35 : vector<16x1xf32>
    %37 = vector.broadcast %36 : vector<16x1xf32> to vector<16x128xf32>
    %38 = arith.subf %32, %37 : vector<16x128xf32>
    %c0_17 = arith.constant 0 : index
    %c0_18 = arith.constant 0 : index
    %39 = vector.load %arg6[%c0_17, %c0_18] : memref<16x128xf32, #tpu.memory_space<vmem>>, vector<16x128xf32>
    tpu.vector_store %arg6[%c0_17, %c0_18], %38 {strides = array<i32>} : memref<16x128xf32, #tpu.memory_space<vmem>>, vector<16x128xf32>,
    return
  }
  func.func @transform_0(%arg0: i32) -> (i32, i32) {
    %c0_i32 = arith.constant 0 : i32
    %c0_i32_0 = arith.constant 0 : i32
    return %arg0, %c0_i32 : i32, i32
  }
  func.func @transform_1(%arg0: i32) -> (i32, i32) {
    %c0_i32 = arith.constant 0 : i32
    %c0_i32_0 = arith.constant 0 : i32
    %c0_i32_1 = arith.constant 0 : i32
    return %c0_i32, %c0_i32_0 : i32, i32
  }
  func.func @transform_2(%arg0: i32) -> (i32, i32) {
    %c0_i32 = arith.constant 0 : i32
    %c0_i32_0 = arith.constant 0 : i32
    %c0_i32_1 = arith.constant 0 : i32
    return %c0_i32, %c0_i32_0 : i32, i32
  }
  func.func @transform_3(%arg0: i32) -> (i32, i32) {
    %c0_i32 = arith.constant 0 : i32
    %c0_i32_0 = arith.constant 0 : i32
    %c0_i32_1 = arith.constant 0 : i32
    return %c0_i32, %c0_i32_0 : i32, i32
  }
  func.func @transform_4(%arg0: i32) -> (i32, i32) {
    %c0_i32 = arith.constant 0 : i32
    %c0_i32_0 = arith.constant 0 : i32
    %c0_i32_1 = arith.constant 0 : i32
    return %c0_i32, %c0_i32_0 : i32, i32
  }
  func.func @transform_5(%arg0: i32) -> (i32, i32) {
    %c0_i32 = arith.constant 0 : i32
    %c0_i32_0 = arith.constant 0 : i32
    return %arg0, %c0_i32 : i32, i32
  }
}

</mosaic_0001>

<bundles_post_ra>
// kernel: tpu_custom_call.1
= control target key start
LH: loop header
LB: loop body
LE: loop exit
PB: predicated region body
PF: predicated region fallthrough
CT: control target
= control target key end

     0   :  { %10 = vsyncpa [#allocation3], 0  ;;  %s1723_s0 = inlined_call_operand.vmem [shape: f32[16,8], index: 0, kind: input, shape index: {}]   ;;  %s1724_s1 = inlined_call_operand.vmem [shape: f32[8,256], index: 1, kind: input, shape index: {}]   ;;  %s1725_s2 = inlined_call_operand.hbm [shape: f32[8,256], index: 2, kind: input, shape index: {}]   ;;  %s1726_s3 = inlined_call_operand.hbm [shape: f32[256,512], index: 3, kind: input, shape index: {}]   ;;  %s1727_s4 = inlined_call_operand.hbm [shape: f32[256,128], index: 4, kind: input, shape index: {}]   ;;  %s1728_s5 = inlined_call_operand.hbm [shape: f32[16,128], index: 5, kind: output, shape index: {}]  }
   0x1   :  { %11 = vsyncpa [#allocation6], 0 }
   0x2   :  { %12 = vsyncpa [#allocation4], 0  ;;  %s1501_s18 = smov [#allocation5]   ;;  %s1407_s22 = scalar_lea.hbm %s1726_s3, 16384 }
   0x3   :  { %s32_s19 = sshll.u32 %s1501_s18, 4  ;;  %p1408_p0 = scmp.ne.s32.totalorder %s1726_s3, %s1407_s22  ;;  %s33_s19 = int_to_ptr.vmem [resolvable:$true] %s32_s19 }
   0x4   :  { %p1411_p1 = scmp.lt.u32.totalorder %s1407_s22, %s1726_s3 }
   0x6   :  { %p1413_p2 = pnand %p1411_p1, %p1408_p0 }
   0x8   :  { %1416 = shalt.err (!%p1413_p2)
}
   0x9   :  { %s1417_s27 = scalar_lea.vmem %s33_s19, 16384  ;;  %p1422_p4 = scmp.lt.s32.totalorder %s33_s19, %s33_s19 }
   0xa   :  { %p1418_p3 = scmp.ne.s32.totalorder %s33_s19, %s1417_s27  ;;  %p1423_p5 = scmp.lt.s32.totalorder %s1417_s27, %s1417_s27 }
   0xc   :  { %p1424_p6 = por %p1423_p5, %p1422_p4 }
   0xe   :  { %p1425_p7 = pnand %p1424_p6, %p1418_p3 }
  0x10   :  { %1428 = shalt.err (!%p1425_p7)
}
  0x11   :  { %s1502_s28 = smov 512   ;;  %s1503_s29 = smov 32  }
  0x12   :  { %38 = dma.hbm_to_vmem [thread:$0]  %s1726_s3, 16384, %s33_s19, [#allocation6], %s1502_s28, %s1502_s28, %s1503_s29  }
  0x13   :  { %s1504_s7 = smov [#allocation2]   ;;  %s1505_s9 = smov [#allocation7]  }
  0x14   :  { %s23_s8 = sshll.u32 %s1504_s7, 4  ;;  %s44_s10 = sshll.u32 %s1505_s9, 4  ;;  %s24_s8 = int_to_ptr.vmem [resolvable:$true] %s23_s8  ;;  %s45_s10 = int_to_ptr.vmem [resolvable:$true] %s44_s10 }
  0x15   :  { %s1429_s13 = scalar_lea.hbm %s1725_s2, 256 }
  0x16   :  { %p1430_p8 = scmp.ne.s32.totalorder %s1725_s2, %s1429_s13  ;;  %p1433_p9 = scmp.lt.u32.totalorder %s1429_s13, %s1725_s2 }
  0x18   :  { %p1435_p10 = pnand %p1433_p9, %p1430_p8 }
  0x1a   :  { %1438 = shalt.err (!%p1435_p10)
}
  0x1b   :  { %s1439_s3 = scalar_lea.vmem %s24_s8, 256  ;;  %p1444_p12 = scmp.lt.s32.totalorder %s24_s8, %s24_s8 }
  0x1c   :  { %p1440_p11 = scmp.ne.s32.totalorder %s24_s8, %s1439_s3  ;;  %p1445_p13 = scmp.lt.s32.totalorder %s1439_s3, %s1439_s3 }
  0x1e   :  { %p1446_p0 = por %p1445_p13, %p1444_p12 }
  0x20   :  { %p1447_p1 = pnand %p1446_p0, %p1440_p11 }
  0x22   :  { %1450 = shalt.err (!%p1447_p1)
}
  0x23   :  { %26 = dma.hbm_to_vmem [thread:$0]  %s1725_s2, 256, %s24_s8, [#allocation3]  }
  0x24   :  { %s1451_s22 = scalar_lea.hbm %s1727_s4, 4096 }
  0x25   :  { %p1452_p2 = scmp.ne.s32.totalorder %s1727_s4, %s1451_s22  ;;  %p1455_p3 = scmp.lt.u32.totalorder %s1451_s22, %s1727_s4 }
  0x27   :  { %p1457_p4 = pnand %p1455_p3, %p1452_p2 }
  0x29   :  { %1460 = shalt.err (!%p1457_p4)
}
  0x2a   :  { %s1461_s27 = scalar_lea.vmem %s45_s10, 4096  ;;  %p1466_p6 = scmp.lt.s32.totalorder %s45_s10, %s45_s10 }
  0x2b   :  { %p1462_p5 = scmp.ne.s32.totalorder %s45_s10, %s1461_s27  ;;  %p1467_p7 = scmp.lt.s32.totalorder %s1461_s27, %s1461_s27 }
  0x2d   :  { %p1468_p8 = por %p1467_p7, %p1466_p6 }
  0x2f   :  { %p1469_p9 = pnand %p1468_p8, %p1462_p5 }
  0x31   :  { %1472 = shalt.err (!%p1469_p9)
}
  0x32   :  { %s1506_s2 = smov 128   ;;  %s1507_s28 = smov 8  }
  0x33   :  { %50 = dma.hbm_to_vmem [thread:$0]  %s1727_s4, 4096, %s45_s10, [#allocation6], %s1506_s2, %s1506_s2, %s1507_s28  }
  0x34   :  { %1495 = dma.done.wait [#allocation3], 256  }
  0x35   :  { %1496 = vsyncadd [#allocation3], 4294967040 }
  0x36   :  { %1497 = dma.done.wait [#allocation6], 20480  }
  0x37   :  { %1498 = vsyncadd [#allocation6], 4294946816  ;;  %v1508_v0 = vmov 0.0   ;;  %v503_v1 = vld [vmem:[#allocation2 + $0x8] sm:$0xff]  ;;  %v502_v2 = vld [vmem:[#allocation2] sm:$0xff] }
  0x38   :  { %575 = vmatprep.mubr.f32.mxu0 %v1508_v0  ;;  %v501_v3 = vld [vmem:[%s1724_s1 + $0x8] sm:$0xff]  ;;  %511 = vmatprep.subr.mxu0 %v503_v1  ;;  %v60_v4 = vld [vmem:[%s1723_s0] sm:$0xff] }
  0x39   :  { %v61_v5 = vld [vmem:[%s1723_s0 + $0x8] sm:$0xff]  ;;  %512 = vmatpush1.msra.mxu0 %v502_v2  ;;  %v1120_v6 = vmul.f32 -1.442695, %v60_v4  ;;  %v679_v15 = vld [vmem:[#allocation5] sm:$0xff] }
  0x3a   :  { %v1121_v7 = vmul.f32 -1.442695, %v61_v5  ;;  %594 = vmatprep.subr.mxu0 %v501_v3  ;;  %v680_v12 = vld [vmem:[#allocation5 + $0x8] sm:$0xff]  ;;  %v683_v16 = vld [vmem:[#allocation5 + $0x20] sm:$0xff] }
  0x3b   :  { %1367 = vpow2.f32 %v1120_v6  ;;  %v684_v13 = vld [vmem:[#allocation5 + $0x28] sm:$0xff]  ;;  %v1182_v17 = vpack.c.bf16 %v683_v16, %v679_v15  ;;  %v687_v21 = vld [vmem:[#allocation5 + $0x40] sm:$0xff] }
  0x3c   :  { %1369 = vpow2.f32 %v1121_v7  ;;  %v1180_v14 = vpack.c.bf16 %v684_v13, %v680_v12  ;;  %v688_v18 = vld [vmem:[#allocation5 + $0x48] sm:$0xff]  ;;  %v691_v22 = vld [vmem:[#allocation5 + $0x60] sm:$0xff] }
  0x3d   :  { %v692_v19 = vld [vmem:[#allocation5 + $0x68] sm:$0xff]  ;;  %v1186_v23 = vpack.c.bf16 %v691_v22, %v687_v21  ;;  %v695_v27 = vld [vmem:[#allocation5 + $0x80] sm:$0xff] }
  0x3e   :  { %1181 = vmatprep.subr.bf16.mxu1 %v1180_v14  ;;  %v1184_v20 = vpack.c.bf16 %v692_v19, %v688_v18  ;;  %v696_v24 = vld [vmem:[#allocation5 + $0x88] sm:$0xff]  ;;  %v699_v28 = vld [vmem:[#allocation5 + $0xa0] sm:$0xff] }
  0x3f   :  { %1183 = vmatpush1.bf16.msra.mxu1 %v1182_v17  ;;  %v700_v25 = vld [vmem:[#allocation5 + $0xa8] sm:$0xff]  ;;  %v1190_v29 = vpack.c.bf16 %v699_v28, %v695_v27  ;;  %v703_v33 = vld [vmem:[#allocation5 + $0xc0] sm:$0xff]  ;;  %v1511_v27 = vmov 2131351028  }
  0x40   :  { %1185 = vmatprep.subr.bf16.mxu1 %v1184_v20  ;;  %v1188_v26 = vpack.c.bf16 %v700_v25, %v696_v24  ;;  %v704_v30 = vld [vmem:[#allocation5 + $0xc8] sm:$0xff]  ;;  %v707_v34 = vld [vmem:[#allocation5 + $0xe0] sm:$0xff]  ;;  %v1510_v25 = vmov 2475754826  }
  0x41   :  { %v708_v31 = vld [vmem:[#allocation5 + $0xe8] sm:$0xff]  ;;  %v1194_v40 = vpack.c.bf16 %v707_v34, %v703_v33  ;;  %v711_v43 = vld [vmem:[#allocation5 + $0x100] sm:$0xff] }
  0x42   :  { %v1192_v32 = vpack.c.bf16 %v708_v31, %v704_v30  ;;  %v712_v35 = vld [vmem:[#allocation5 + $0x108] sm:$0xff]  ;;  %v715_v44 = vld [vmem:[#allocation5 + $0x120] sm:$0xff]  ;;  %v1513_v31 = vmov 920167782  }
  0x43   :  { %1187 = vmatpush1.bf16.msra.mxu1 %v1186_v23  ;;  %v716_v37 = vld [vmem:[#allocation5 + $0x128] sm:$0xff]  ;;  %v1198_v53 = vpack.c.bf16 %v715_v44, %v711_v43  ;;  %v719_v57 = vld [vmem:[#allocation5 + $0x140] sm:$0xff]  ;;  %v1509_v23 = vmov 683565275  }
  0x44   :  { %1189 = vmatprep.subr.bf16.mxu1 %v1188_v26  ;;  %v1196_v42 = vpack.c.bf16 %v716_v37, %v712_v35  ;;  %v720_v47 = vld [vmem:[#allocation5 + $0x148] sm:$0xff]  ;;  %v723_v58 = vld [vmem:[#allocation5 + $0x160] sm:$0xff] }
  0x45   :  { %v1368_v8 = vpop.eup %1367  ;;  %v724_v48 = vld [vmem:[#allocation5 + $0x168] sm:$0xff]  ;;  %v1202_v2 = vpack.c.bf16 %v723_v58, %v719_v57  ;;  %v727_v6 = vld [vmem:[#allocation5 + $0x180] sm:$0xff] }
  0x46   :  { %v1370_v9 = vpop.eup %1369  ;;  %v68_v10 = vadd.f32 1.0, %v1368_v8  ;;  %v1200_v56 = vpack.c.bf16 %v724_v48, %v720_v47  ;;  %v728_v60 = vld [vmem:[#allocation5 + $0x188] sm:$0xff]  ;;  %v731_v7 = vld [vmem:[#allocation5 + $0x1a0] sm:$0xff] }
  0x47   :  { %v69_v11 = vadd.f32 1.0, %v1370_v9  ;;  %1191 = vmatpush1.bf16.msra.mxu1 %v1190_v29  ;;  %v732_v61 = vld [vmem:[#allocation5 + $0x1a8] sm:$0xff]  ;;  %v1206_v17 = vpack.c.bf16 %v731_v7, %v727_v6  ;;  %v1512_v29 = vmov 2102212464  }
  0x48   :  { %1371 = vrcp.f32 %v68_v10  ;;  %1193 = vmatprep.subr.bf16.mxu1 %v1192_v32  ;;  %v1204_v5 = vpack.c.bf16 %v732_v61, %v728_v60  ;;  %v736_v8 = vld [vmem:[#allocation5 + $0x1c8] sm:$0xff]  ;;  %v735_v10 = vld [vmem:[#allocation5 + $0x1c0] sm:$0xff] }
  0x49   :  { %1373 = vrcp.f32 %v69_v11  ;;  %v740_v9 = vld [vmem:[#allocation5 + $0x1e8] sm:$0xff]  ;;  %v739_v11 = vld [vmem:[#allocation5 + $0x1e0] sm:$0xff] }
  0x4a   :  { %v1208_v20 = vpack.c.bf16 %v740_v9, %v736_v8  ;;  %v1210_v21 = vpack.c.bf16 %v739_v11, %v735_v10 }
  0x4b   :  { %1195 = vmatpush1.bf16.msra.mxu1 %v1194_v40  ;;  %v1514_v40 = vmov 1326507024  }
  0x4c   :  { %1197 = vmatprep.subr.bf16.mxu1 %v1196_v42 }
  0x4f   :  { %1199 = vmatpush1.bf16.msra.mxu1 %v1198_v53 }
  0x50   :  { %1201 = vmatprep.subr.bf16.mxu1 %v1200_v56 }
  0x52   :  { %v1372_v36 = vpop.eup %1371 }
  0x53   :  { %v1374_v38 = vpop.eup %1373  ;;  %v1595_v39 = vmul.f32 0.7853982, %v1372_v36  ;;  %1203 = vmatpush1.bf16.msra.mxu1 %v1202_v2 }
  0x54   :  { %v1597_v41 = vmul.f32 0.7853982, %v1374_v38  ;;  %1205 = vmatprep.subr.bf16.mxu1 %v1204_v5 }
  0x55   :  { %v76_v45 = vand.u32 2147483647, %v1595_v39  ;;  %v79_v46 = vand.u32 2139095040, %v1595_v39  ;;  %vm78_vm14 = vcmp.lt.s32.totalorder %v1595_v39, 0 }
  0x56   :  { %v179_v49 = vand.u32 2147483647, %v1597_v41  ;;  %v182_v50 = vand.u32 2139095040, %v1597_v41 }
  0x57   :  { %v80_v51 = vshrl.u32 %v79_v46, 23  ;;  %v83_v52 = vand.u32 8388607, %v76_v45  ;;  %1207 = vmatpush1.bf16.msra.mxu1 %v1206_v17  ;;  %vm77_vm15 = vcmp.le.f32.partialorder %v76_v45, 0.7853982 }
  0x58   :  { %v183_v54 = vshrl.u32 %v182_v50, 23  ;;  %v186_v55 = vand.u32 8388607, %v179_v49  ;;  %1209 = vmatprep.subr.bf16.mxu1 %v1208_v20 }
  0x59   :  { %v1122_v59 = vadd.s32 4294967169, %v80_v51  ;;  %v84_v62 = vor.u32 8388608, %v83_v52 }
  0x5a   :  { %v1126_v63 = vadd.s32 4294967169, %v183_v54  ;;  %v187_v3 = vor.u32 8388608, %v186_v55 }
  0x5b   :  { %v86_v1 = vadd.s32 1, %v1122_v59  ;;  %v1607_v13 = vshll.u32 %v84_v62, 8  ;;  %1211 = vmatpush1.bf16.msra.mxu1 %v1210_v21 }
  0x5c   :  { %v189_v4 = vadd.s32 1, %v1126_v63  ;;  %v1611_v19 = vshll.u32 %v187_v3, 8 }
  0x5d   :  { %vm87_vm0 = vcmp.gt.s32.totalorder %v86_v1, 0 }
  0x5e   :  { %v88_v12 = vsel %vm87_vm0, %v86_v1, 0  ;;  %vm190_vm1 = vcmp.gt.s32.totalorder %v189_v4, 0  ;;  %vm181_vm0 = vcmp.lt.s32.totalorder %v1597_v41, 0 }
  0x5f   :  { %v89_v14 = vshrl.u32 %v88_v12, 5  ;;  %v90_v15 = vand.u32 31, %v88_v12  ;;  %v191_v16 = vsel %vm190_vm1, %v189_v4, 0  ;;  %vm180_vm1 = vcmp.le.f32.partialorder %v179_v49, 0.7853982 }
  0x60   :  { %v1609_v18 = vand.u32 31, %v191_v16  ;;  %v1613_v33 = vshrl.u32 %v191_v16, 5 }
  0x61   :  { %v91_v22 = vsub.s32 32, %v90_v15  ;;  %v93_v24 = vshll.u32 %v1509_v23, %v90_v15  ;;  %v96_v26 = vshll.u32 %v1510_v25, %v90_v15  ;;  %v99_v28 = vshll.u32 %v1511_v27, %v90_v15 }
  0x62   :  { %v102_v30 = vshll.u32 %v1512_v29, %v90_v15  ;;  %v105_v32 = vshll.u32 %v1513_v31, %v90_v15  ;;  %vm108_vm2 = vcmp.lt.s32.totalorder %v89_v14, 1  ;;  %vm109_vm3 = vcmp.lt.s32.totalorder %v89_v14, 2 }
  0x63   :  { %v92_v34 = vshrl.u32 %v1509_v23, %v91_v22  ;;  %v94_v35 = vshrl.u32 %v1510_v25, %v91_v22  ;;  %v97_v36 = vshrl.u32 %v1511_v27, %v91_v22  ;;  %v100_v37 = vshrl.u32 %v1512_v29, %v91_v22 }
  0x64   :  { %v103_v38 = vshrl.u32 %v1513_v31, %v91_v22  ;;  %v106_v42 = vshrl.u32 %v1514_v40, %v91_v22  ;;  %vm111_vm4 = vcmp.lt.s32.totalorder %v89_v14, 4  ;;  %v194_v47 = vsub.s32 32, %v1609_v18 }
  0x65   :  { %v95_v43 = vor.u32 %v94_v35, %v93_v24  ;;  %v98_v44 = vor.u32 %v97_v36, %v96_v26  ;;  %v101_v46 = vor.u32 %v100_v37, %v99_v28  ;;  %vm110_vm5 = vcmp.lt.s32.totalorder %v89_v14, 3  ;;  %v744_v26 = vld [vmem:[#allocation5 + $0x208] sm:$0xff]  ;;  %v743_v36 = vld [vmem:[#allocation5 + $0x200] sm:$0xff] }
  0x66   :  { %v104_v48 = vor.u32 %v103_v38, %v102_v30  ;;  %v107_v50 = vor.u32 %v106_v42, %v105_v32  ;;  %v196_v51 = vshll.u32 %v1509_v23, %v1609_v18  ;;  %v199_v59 = vshll.u32 %v1510_v25, %v1609_v18 }
  0x67   :  { %v112_v52 = vsel %vm108_vm2, %v92_v34, %v95_v43  ;;  %v113_v53 = vsel %vm111_vm4, %v101_v46, 2102212464  ;;  %v116_v54 = vsel %vm108_vm2, %v95_v43, %v98_v44  ;;  %v120_v55 = vsel %vm108_vm2, %v98_v44, %v101_v46  ;;  %v747_v43 = vld [vmem:[#allocation5 + $0x220] sm:$0xff] }
  0x68   :  { %v114_v56 = vsel %vm110_vm5, %v98_v44, %v113_v53  ;;  %v117_v57 = vsel %vm111_vm4, %v104_v48, 920167782  ;;  %v121_v58 = vsel %vm111_vm4, %v107_v50, 1326507024  ;;  %v195_v62 = vshrl.u32 %v1509_v23, %v194_v47  ;;  %v752_v44 = vld [vmem:[#allocation5 + $0x248] sm:$0xff] }
  0x69   :  { %v118_v60 = vsel %vm110_vm5, %v101_v46, %v117_v57  ;;  %v122_v61 = vsel %vm110_vm5, %v104_v48, %v121_v58  ;;  %v197_v63 = vshrl.u32 %v1510_v25, %v194_v47  ;;  %v115_v1 = vsel %vm109_vm3, %v112_v52, %v114_v56  ;;  %v756_v46 = vld [vmem:[#allocation5 + $0x268] sm:$0xff] }
  0x6a   :  { %v119_v2 = vsel %vm109_vm3, %v116_v54, %v118_v60  ;;  %v123_v3 = vsel %vm109_vm3, %v120_v55, %v122_v61  ;;  %v200_v4 = vshrl.u32 %v1511_v27, %v194_v47  ;;  %v202_v11 = vshll.u32 %v1511_v27, %v1609_v18  ;;  %v751_v54 = vld [vmem:[#allocation5 + $0x240] sm:$0xff]  ;;  %v764_v60 = vld [vmem:[#allocation5 + $0x2a8] sm:$0xff] }
  0x6b   :  { %v1628_v5 = vmul.u32.u64.low %v1607_v13, %v123_v3  ;;  %v1629_v6 = vmul.u32.u64.high %v1607_v13, %v123_v3, %v1628_v5  ;;  %v1632_v7 = vmul.u32.u64.low %v1607_v13, %v119_v2  ;;  %v1633_v8 = vmul.u32.u64.high %v1607_v13, %v119_v2, %v1632_v7  ;;  %v755_v55 = vld [vmem:[#allocation5 + $0x260] sm:$0xff] }
  0x6c   :  { %v198_v9 = vor.u32 %v197_v63, %v196_v51  ;;  %v201_v10 = vor.u32 %v200_v4, %v199_v59  ;;  %v203_v12 = vshrl.u32 %v1512_v29, %v194_v47  ;;  %v205_v15 = vshll.u32 %v1512_v29, %v1609_v18  ;;  %v760_v59 = vld [vmem:[#allocation5 + $0x288] sm:$0xff]  ;;  %v759_v2 = vld [vmem:[#allocation5 + $0x280] sm:$0xff] }
  0x6d   :  { %v206_v16 = vshrl.u32 %v1513_v31, %v194_v47  ;;  %v208_v14 = vshll.u32 %v1513_v31, %v1609_v18  ;;  %v209_v17 = vshrl.u32 %v1514_v40, %v194_v47  ;;  %v131_v20 = vmul.u32 %v1607_v13, %v115_v1  ;;  %v748_v13 = vld [vmem:[#allocation5 + $0x228] sm:$0xff]  ;;  %v763_v3 = vld [vmem:[#allocation5 + $0x2a0] sm:$0xff] }
  0x6e   :  { %v204_v21 = vor.u32 %v203_v12, %v202_v11  ;;  %vm211_vm6 = vcmp.lt.s32.totalorder %v1613_v33, 1  ;;  %vm212_vm7 = vcmp.lt.s32.totalorder %v1613_v33, 2  ;;  %vm133_vm8 = vc.u32 %v1629_v6, %v1632_v7 }
  0x6f   :  { %v134_v22 = vadd.s32 1, %v1633_v8  ;;  %v207_v23 = vor.u32 %v206_v16, %v205_v15  ;;  %vm213_vm9 = vcmp.lt.s32.totalorder %v1613_v33, 3  ;;  %v210_v24 = vor.u32 %v209_v17, %v208_v14  ;;  %v767_v16 = vld [vmem:[#allocation5 + $0x2c0] sm:$0xff] }
  0x70   :  { %vm214_vm10 = vcmp.lt.s32.totalorder %v1613_v33, 4  ;;  %v215_v18 = vsel %vm211_vm6, %v195_v62, %v198_v9  ;;  %v219_v25 = vsel %vm211_vm6, %v198_v9, %v201_v10  ;;  %v223_v30 = vsel %vm211_vm6, %v201_v10, %v204_v21  ;;  %v772_v9 = vld [vmem:[#allocation5 + $0x2e8] sm:$0xff]  ;;  %v771_v14 = vld [vmem:[#allocation5 + $0x2e0] sm:$0xff] }
  0x71   :  { %v135_v27 = vsel %vm133_vm8, %v134_v22, %v1633_v8  ;;  %v216_v28 = vsel %vm214_vm10, %v204_v21, 2102212464  ;;  %v220_v29 = vsel %vm214_vm10, %v207_v23, 920167782  ;;  %v224_v35 = vsel %vm214_vm10, %v210_v24, 1326507024 }
  0x72   :  { %v136_v31 = vadd.s32 %v135_v27, %v131_v20  ;;  %v217_v32 = vsel %vm213_vm9, %v201_v10, %v216_v28  ;;  %v221_v34 = vsel %vm213_vm9, %v204_v21, %v220_v29  ;;  %v225_v40 = vsel %vm213_vm9, %v207_v23, %v224_v35  ;;  %v768_v8 = vld [vmem:[#allocation5 + $0x2c8] sm:$0xff] }
  0x73   :  { %v218_v37 = vsel %vm212_vm7, %v215_v18, %v217_v32  ;;  %v222_v38 = vsel %vm212_vm7, %v219_v25, %v221_v34  ;;  %v1212_v42 = vpack.c.bf16 %v748_v13, %v744_v26  ;;  %v226_v48 = vsel %vm212_vm7, %v223_v30, %v225_v40 }
  0x74   :  { %v137_v47 = vadd.s32 536870912, %v136_v31  ;;  %v1661_v50 = vmul.u32.u64.low %v1611_v19, %v222_v38  ;;  %v1662_v51 = vmul.u32.u64.high %v1611_v19, %v222_v38, %v1661_v50  ;;  %v1214_v57 = vpack.c.bf16 %v747_v43, %v743_v36 }
  0x75   :  { %v1665_v52 = vmul.u32.u64.low %v1611_v19, %v226_v48  ;;  %v1666_v53 = vmul.u32.u64.high %v1611_v19, %v226_v48, %v1665_v52  ;;  %1213 = vmatprep.subr.bf16.mxu1 %v1212_v42  ;;  %v1216_v58 = vpack.c.bf16 %v756_v46, %v752_v44  ;;  %v234_v33 = vmul.u32 %v1611_v19, %v218_v37 }
  0x76   :  { %v1668_v56 = vshrl.u32 %v137_v47, 30  ;;  %v237_v62 = vadd.s32 1, %v1662_v51  ;;  %1215 = vmatpush1.bf16.msra.mxu1 %v1214_v57  ;;  %v1218_v63 = vpack.c.bf16 %v755_v55, %v751_v54  ;;  %v1220_v1 = vpack.c.bf16 %v764_v60, %v760_v59 }
  0x77   :  { %vm236_vm11 = vc.u32 %v1666_v53, %v1661_v50  ;;  %1217 = vmatprep.subr.bf16.mxu1 %v1216_v58  ;;  %v1222_v19 = vpack.c.bf16 %v763_v3, %v759_v2  ;;  %v1224_v15 = vpack.c.bf16 %v772_v9, %v768_v8  ;;  %v1226_v22 = vpack.c.bf16 %v771_v14, %v767_v16 }
  0x78   :  { %v139_v61 = vshll.u32 %v1668_v56, 30  ;;  %v238_v5 = vsel %vm236_vm11, %v237_v62, %v1662_v51  ;;  %v132_v25 = vadd.s32 %v1632_v7, %v1629_v6  ;;  %v235_v42 = vadd.s32 %v1661_v50, %v1666_v53 }
  0x79   :  { %v239_v10 = vadd.s32 %v238_v5, %v234_v33  ;;  %v162_v7 = vsub.s32 4, %v1668_v56  ;;  %vm168_vm5 = vweird.f32 %v1595_v39 }
  0x7a   :  { %v140_v4 = vsub.s32 %v136_v31, %v139_v61  ;;  %1219 = vmatpush1.bf16.msra.mxu1 %v1218_v63 }
  0x7b   :  { %v240_v12 = vadd.s32 536870912, %v239_v10  ;;  %1221 = vmatprep.subr.bf16.mxu1 %v1220_v1  ;;  %v163_v55 = vsel %vm78_vm14, %v162_v7, %v1668_v56 }
  0x7c   :  { %v142_v11 = vsub.s32 0, %v140_v4  ;;  %v165_v59 = vsel %vm77_vm15, 0, %v163_v55 }
  0x7d   :  { %v241_v20 = vshrl.u32 %v240_v12, 30  ;;  %v379_v63 = vadd.s32 3, %v165_v59 }
  0x7e   :  { %v1123_v17 = vmin.u32 %v142_v11, %v140_v4  ;;  %1223 = vmatpush1.bf16.msra.mxu1 %v1222_v19 }
  0x7f   :  { %v242_v23 = vshll.u32 %v241_v20, 30  ;;  %1225 = vmatprep.subr.bf16.mxu1 %v1224_v15  ;;  %v265_v62 = vsub.s32 4, %v241_v20  ;;  %v380_v2 = vand.u32 3, %v379_v63  ;;  %v701_v63 = vld [vmem:[#allocation5 + $0xb0] sm:$0xff] }
  0x80   :  { %v144_v21 = vclz %v1123_v17 }
  0x81   :  { %v243_v18 = vsub.s32 %v239_v10, %v242_v23  ;;  %v266_v56 = vsel %vm181_vm0, %v265_v62, %v241_v20  ;;  %vm385_vm2 = vcmp.eq.s32.totalorder %v380_v2, 2  ;;  %v169_v10 = vand.u32 3, %v165_v59  ;;  %v702_v59 = vld [vmem:[#allocation5 + $0xb8] sm:$0xff]  ;;  %v697_v62 = vld [vmem:[#allocation5 + $0x90] sm:$0xff] }
  0x82   :  { %v1124_v24 = vadd.s32 4294967294, %v144_v21  ;;  %1227 = vmatpush1.bf16.msra.mxu1 %v1226_v22  ;;  %v268_v5 = vsel %vm180_vm1, 0, %v266_v56  ;;  %vm382_vm3 = vcmp.eq.s32.totalorder %v380_v2, 0  ;;  %vm381_vm4 = vcmp.lt.s32.totalorder %v380_v2, 2 }
  0x83   :  { %v245_v13 = vsub.s32 0, %v243_v18  ;;  %v483_v19 = vadd.s32 3, %v268_v5  ;;  %vm171_vm6 = vcmp.eq.s32.totalorder %v169_v10, 0  ;;  %vm174_vm7 = vcmp.eq.s32.totalorder %v169_v10, 2 }
  0x84   :  { %vm1125_vm12 = vcmp.lt.s32.totalorder %v1124_v24, 0  ;;  %v272_v20 = vand.u32 3, %v268_v5  ;;  %vm170_vm8 = vcmp.lt.s32.totalorder %v169_v10, 2  ;;  %v1254_v56 = vpack.c.bf16 %v701_v63, %v697_v62  ;;  %v714_v5 = vld [vmem:[#allocation5 + $0x118] sm:$0xff]  ;;  %v713_v10 = vld [vmem:[#allocation5 + $0x110] sm:$0xff] }
  0x85   :  { %v147_v26 = vsel %vm1125_vm12, 0, %v1124_v24  ;;  %v1127_v30 = vmin.u32 %v245_v13, %v243_v18  ;;  %v484_v14 = vand.u32 3, %v483_v19  ;;  %v722_v19 = vld [vmem:[#allocation5 + $0x158] sm:$0xff] }
  0x86   :  { %v148_v27 = vsub.s32 32, %v147_v26  ;;  %v149_v28 = vshll.u32 %v140_v4, %v147_v26  ;;  %v152_v29 = vsub.s32 4294967266, %v147_v26  ;;  %vm274_vm11 = vcmp.eq.s32.totalorder %v272_v20, 0 }
  0x87   :  { %v247_v34 = vclz %v1127_v30  ;;  %vm489_vm9 = vcmp.eq.s32.totalorder %v484_v14, 2  ;;  %vm486_vm10 = vcmp.eq.s32.totalorder %v484_v14, 0  ;;  %vm277_vm12 = vcmp.eq.s32.totalorder %v272_v20, 2 }
  0x88   :  { %v150_v31 = vshrl.u32 %v132_v25, %v148_v27  ;;  %v153_v32 = vadd.s32 127, %v152_v29 }
  0x89   :  { %v1128_v37 = vadd.s32 4294967294, %v247_v34 }
  0x8a   :  { %v151_v35 = vor.u32 %v150_v31, %v149_v28  ;;  %v154_v36 = vshll.u32 %v153_v32, 23 }
  0x8b   :  { %vm1129_vm13 = vcmp.lt.s32.totalorder %v1128_v37, 0 }
  0x8c   :  { %v155_v38 = vor.u32 4788187, %v154_v36  ;;  %v158_v40 = vcvt.s32.f32 %v151_v35  ;;  %v250_v43 = vsel %vm1129_vm13, 0, %v1128_v37  ;;  %vm485_vm13 = vcmp.lt.s32.totalorder %v484_v14, 2  ;;  %v682_v37 = vld [vmem:[#allocation5 + $0x18] sm:$0xff]  ;;  %v725_v14 = vld [vmem:[#allocation5 + $0x170] sm:$0xff] }
  0x8d   :  { %v251_v44 = vsub.s32 32, %v250_v43  ;;  %v252_v46 = vshll.u32 %v243_v18, %v250_v43  ;;  %v255_v47 = vsub.s32 4294967266, %v250_v43 }
  0x8e   :  { %v156_v6 = vand.u32 2147483647, %v155_v38  ;;  %v686_v38 = vld [vmem:[#allocation5 + $0x38] sm:$0xff] }
  0x8f   :  { %v253_v51 = vshrl.u32 %v235_v42, %v251_v44  ;;  %v256_v52 = vadd.s32 127, %v255_v47  ;;  %v1244_v7 = vpack.c.bf16 %v686_v38, %v682_v37  ;;  %v681_v47 = vld [vmem:[#allocation5 + $0x10] sm:$0xff]  ;;  %v758_v37 = vld [vmem:[#allocation5 + $0x278] sm:$0xff] }
  0x90   :  { %v159_v48 = vmul.f32 %v158_v40, %v156_v6 }
  0x91   :  { %v254_v50 = vor.u32 %v253_v51, %v252_v46  ;;  %v257_v53 = vshll.u32 %v256_v52, 23  ;;  %v694_v51 = vld [vmem:[#allocation5 + $0x78] sm:$0xff] }
  0x92   :  { %v160_v54 = vxor.u32 2147483648, %v159_v48 }
  0x93   :  { %v258_v60 = vor.u32 4788187, %v257_v53  ;;  %v261_v33 = vcvt.s32.f32 %v254_v50  ;;  %v689_v53 = vld [vmem:[#allocation5 + $0x50] sm:$0xff] }
  0x94   :  { %v161_v57 = vsel %vm78_vm14, %v160_v54, %v159_v48  ;;  %vm271_vm14 = vweird.f32 %v1597_v41  ;;  %v685_v48 = vld [vmem:[#allocation5 + $0x30] sm:$0xff] }
  0x95   :  { %v164_v58 = vsel %vm77_vm15, %v1595_v39, %v161_v57  ;;  %v259_v61 = vand.u32 2147483647, %v258_v60  ;;  %vm273_vm15 = vcmp.lt.s32.totalorder %v272_v20, 2  ;;  %v500_v39 = vld [vmem:[%s1724_s1] sm:$0xff]  ;;  %v1246_v55 = vpack.c.bf16 %v685_v48, %v681_v47  ;;  %v693_v57 = vld [vmem:[#allocation5 + $0x70] sm:$0xff]  ;;  %v734_v20 = vld [vmem:[#allocation5 + $0x1b8] sm:$0xff] }
  0x96   :  { %1375 = vcosq.f32 %v164_v58  ;;  %v765_v47 = vld [vmem:[#allocation5 + $0x2b0] sm:$0xff]  ;;  %v770_v48 = vld [vmem:[#allocation5 + $0x2d8] sm:$0xff]  ;;  %s1515_s1 = smov [#allocation8]  }
  0x97   :  { %1377 = vsinq.f32 %v164_v58  ;;  %v262_v1 = vmul.f32 %v261_v33, %v259_v61  ;;  %v698_v58 = vld [vmem:[#allocation5 + $0x98] sm:$0xff]  ;;  %v1250_v33 = vpack.c.bf16 %v693_v57, %v689_v53  ;;  %v776_v53 = vld [vmem:[#allocation5 + $0x308] sm:$0xff]  ;;  %s1107_s12 = sshll.u32 %s1515_s1, 4  ;;  %s1108_s12 = int_to_ptr.vmem [resolvable:$true] %s1107_s12 }
  0x98   :  { %v1252_v61 = vpack.c.bf16 %v702_v59, %v698_v58  ;;  %v780_v57 = vld [vmem:[#allocation5 + $0x328] sm:$0xff]  ;;  %v778_v58 = vld [vmem:[#allocation5 + $0x318] sm:$0xff]  ;;  %s1473_s13 = scalar_lea.vmem %s1108_s12, 256  ;;  %p1478_p11 = scmp.lt.s32.totalorder %s1108_s12, %s1108_s12 }
  0x99   :  { %v263_v45 = vxor.u32 2147483648, %v262_v1  ;;  %v1228_v59 = vpack.c.bf16 %v780_v57, %v776_v53  ;;  %p1474_p10 = scmp.ne.s32.totalorder %s1108_s12, %s1473_s13  ;;  %p1479_p12 = scmp.lt.s32.totalorder %s1473_s13, %s1473_s13 }
  0x9b   :  { %v264_v3 = vsel %vm181_vm0, %v263_v45, %v262_v1  ;;  %vm504_vm0 = vcmask 64512   ;;  %v706_v1 = vld [vmem:[#allocation5 + $0xd8] sm:$0xff]  ;;  %1229 = vmatprep.subr.bf16.mxu1 %v1228_v59  ;;  %p1480_p13 = por %p1479_p12, %p1478_p11 }
  0x9c   :  { %v267_v4 = vsel %vm180_vm1, %v1597_v41, %v264_v3  ;;  %v690_v41 = vld [vmem:[#allocation5 + $0x58] sm:$0xff]  ;;  %v705_v3 = vld [vmem:[#allocation5 + $0xd0] sm:$0xff] }
  0x9d   :  { %1379 = vcosq.f32 %v267_v4  ;;  %v1248_v50 = vpack.c.bf16 %v694_v51, %v690_v41  ;;  %v710_v45 = vld [vmem:[#allocation5 + $0xf8] sm:$0xff]  ;;  %p1481_p0 = pnand %p1480_p13, %p1474_p10 }
  0x9e   :  { %1381 = vsinq.f32 %v267_v4  ;;  %v1256_v2 = vpack.c.bf16 %v710_v45, %v706_v1  ;;  %v709_v4 = vld [vmem:[#allocation5 + $0xf0] sm:$0xff]  ;;  %v774_v41 = vld [vmem:[#allocation5 + $0x2f8] sm:$0xff] }
  0x9f   :  { %v777_v1 = vld [vmem:[#allocation5 + $0x310] sm:$0xff]  ;;  %v976_v59 = vld [vmem:[#allocation7 + $0x18] sm:$0xff] }
  0xa0   :  { %v1376_v8 = vpop.eup %1375  ;;  %v781_v45 = vld [vmem:[#allocation5 + $0x330] sm:$0xff] }
  0xa1   :  { %v1378_v9 = vpop.eup %1377  ;;  %v175_v11 = vxor.u32 2147483648, %v1376_v8 }
  0xa2   :  { %v172_v12 = vxor.u32 2147483648, %v1378_v9 }
  0xa3   :  { %v387_v49 = vsel %vm385_vm2, %v175_v11, %v1378_v9  ;;  %v176_v23 = vsel %vm174_vm7, %v175_v11, %v1378_v9  ;;  %v717_v11 = vld [vmem:[#allocation5 + $0x130] sm:$0xff] }
  0xa4   :  { %v384_v15 = vsel %vm382_vm3, %v1376_v8, %v172_v12  ;;  %v173_v22 = vsel %vm171_vm6, %v1376_v8, %v172_v12  ;;  %v718_v8 = vld [vmem:[#allocation5 + $0x138] sm:$0xff] }
  0xa5   :  { %v388_v16 = vsel %vm381_vm4, %v384_v15, %v387_v49  ;;  %v177_v26 = vsel %vm170_vm8, %v173_v22, %v176_v23  ;;  %v1260_v9 = vpack.c.bf16 %v718_v8, %v714_v5  ;;  %v726_v12 = vld [vmem:[#allocation5 + $0x178] sm:$0xff]  ;;  %v1262_v49 = vpack.c.bf16 %v717_v11, %v713_v10  ;;  %v729_v23 = vld [vmem:[#allocation5 + $0x190] sm:$0xff] }
  0xa6   :  { %v389_v17 = vsel %vm168_vm5, nan, %v388_v16  ;;  %v178_v31 = vsel %vm168_vm5, nan, %v177_v26  ;;  %v1264_v15 = vpack.c.bf16 %v726_v12, %v722_v19  ;;  %v721_v16 = vld [vmem:[#allocation5 + $0x150] sm:$0xff]  ;;  %v790_v8 = vld [vmem:[#allocation5 + $0x378] sm:$0xff] }
  0xa7   :  { %v494_v21 = vmax.f32 %v389_v17, 1e-30  ;;  %v1380_v24 = vpop.eup %1379  ;;  %v730_v17 = vld [vmem:[#allocation5 + $0x198] sm:$0xff]  ;;  %v785_v19 = vld [vmem:[#allocation5 + $0x350] sm:$0xff] }
  0xa8   :  { %v1382_v18 = vpop.eup %1381  ;;  %v278_v25 = vxor.u32 2147483648, %v1380_v24  ;;  %v1268_v22 = vpack.c.bf16 %v734_v20, %v730_v17  ;;  %v789_v12 = vld [vmem:[#allocation5 + $0x370] sm:$0xff]  ;;  %v798_v20 = vld [vmem:[#allocation5 + $0x3b8] sm:$0xff] }
  0xa9   :  { %1383 = vlog2.f32 %v494_v21  ;;  %v275_v13 = vxor.u32 2147483648, %v1382_v18  ;;  %v1266_v21 = vpack.c.bf16 %v725_v14, %v721_v16  ;;  %v796_v16 = vld [vmem:[#allocation5 + $0x3a8] sm:$0xff]  ;;  %v794_v14 = vld [vmem:[#allocation5 + $0x398] sm:$0xff] }
  0xaa   :  { %v491_v27 = vsel %vm489_vm9, %v278_v25, %v1382_v18  ;;  %v279_v30 = vsel %vm277_vm12, %v278_v25, %v1382_v18  ;;  %1385 = vlog2.f32 %v178_v31  ;;  %v738_v18 = vld [vmem:[#allocation5 + $0x1d8] sm:$0xff] }
  0xab   :  { %v488_v28 = vsel %vm486_vm10, %v1380_v24, %v275_v13  ;;  %v276_v29 = vsel %vm274_vm11, %v1380_v24, %v275_v13  ;;  %v733_v24 = vld [vmem:[#allocation5 + $0x1b0] sm:$0xff]  ;;  %v742_v25 = vld [vmem:[#allocation5 + $0x1f8] sm:$0xff] }
  0xac   :  { %v492_v32 = vsel %vm485_vm13, %v488_v28, %v491_v27  ;;  %v280_v36 = vsel %vm273_vm15, %v276_v29, %v279_v30  ;;  %v1270_v26 = vpack.c.bf16 %v733_v24, %v729_v23  ;;  %v1272_v13 = vpack.c.bf16 %v742_v25, %v738_v18  ;;  %v737_v27 = vld [vmem:[#allocation5 + $0x1d0] sm:$0xff]  ;;  %v746_v29 = vld [vmem:[#allocation5 + $0x218] sm:$0xff] }
  0xad   :  { %v493_v34 = vsel %vm271_vm14, nan, %v492_v32  ;;  %v281_v42 = vsel %vm271_vm14, nan, %v280_v36  ;;  %v741_v28 = vld [vmem:[#allocation5 + $0x1f0] sm:$0xff]  ;;  %v750_v30 = vld [vmem:[#allocation5 + $0x238] sm:$0xff]  ;;  %v1300_v23 = vpack.c.bf16 %v798_v20, %v794_v14 }
  0xae   :  { %v495_v35 = vmax.f32 %v493_v34, 1e-30  ;;  %v1274_v31 = vpack.c.bf16 %v741_v28, %v737_v27  ;;  %v1276_v32 = vpack.c.bf16 %v750_v30, %v746_v29  ;;  %v745_v34 = vld [vmem:[#allocation5 + $0x210] sm:$0xff]  ;;  %v754_v36 = vld [vmem:[#allocation5 + $0x258] sm:$0xff]  ;;  %v804_v27 = vld [vmem:[#allocation5 + $0x3e8] sm:$0xff] }
  0xaf   :  { %v793_v18 = vld [vmem:[#allocation5 + $0x390] sm:$0xff]  ;;  %v802_v28 = vld [vmem:[#allocation5 + $0x3d8] sm:$0xff] }
  0xb0   :  { %1387 = vlog2.f32 %v495_v35  ;;  %v749_v35 = vld [vmem:[#allocation5 + $0x230] sm:$0xff]  ;;  %v806_v30 = vld [vmem:[#allocation5 + $0x3f8] sm:$0xff] }
  0xb1   :  { %1389 = vlog2.f32 %v281_v42  ;;  %v1278_v38 = vpack.c.bf16 %v749_v35, %v745_v34  ;;  %v753_v42 = vld [vmem:[#allocation5 + $0x250] sm:$0xff]  ;;  %v1304_v34 = vpack.c.bf16 %v806_v30, %v802_v28  ;;  %v1000_v14 = vld [vmem:[#allocation7 + $0xd8] sm:$0xff] }
  0xb2   :  { %v797_v25 = vld [vmem:[#allocation5 + $0x3b0] sm:$0xff] }
  0xb3   :  { %v1384_v40 = vpop.eup %1383  ;;  %v1003_v28 = vld [vmem:[#allocation7 + $0xf0] sm:$0xff] }
  0xb4   :  { %v497_v6 = vmul.f32 0.6931472, %v1384_v40  ;;  %v1386_v43 = vpop.eup %1385  ;;  %v1280_v40 = vpack.c.bf16 %v758_v37, %v754_v36  ;;  %v801_v36 = vld [vmem:[#allocation5 + $0x3d0] sm:$0xff] }
  0xb5   :  { %v283_v52 = vmul.f32 0.6931472, %v1386_v43  ;;  %v805_v37 = vld [vmem:[#allocation5 + $0x3f0] sm:$0xff] }
  0xb6   :  { %1138 = vmatmul.mubr.msk.f32.vlgmr.msra.gmra.mrb[0].mxu0 %vm504_vm0, %v497_v6  ;;  %v757_v6 = vld [vmem:[#allocation5 + $0x270] sm:$0xff] }
  0xb7   :  { %595 = vmatpush1.msra.mxu0 %v500_v39  ;;  %581 = vmatprep.mubr.f32.mxu0 %v1508_v0  ;;  %v762_v39 = vld [vmem:[#allocation5 + $0x298] sm:$0xff]  ;;  %v1282_v43 = vpack.c.bf16 %v757_v6, %v753_v42  ;;  %v990_v42 = vld [vmem:[#allocation7 + $0x88] sm:$0xff] }
  0xb8   :  { %1245 = vmatprep.subr.bf16.mxu0 %v1244_v7  ;;  %v766_v7 = vld [vmem:[#allocation5 + $0x2b8] sm:$0xff] }
  0xba   :  { %v1388_v44 = vpop.eup %1387 }
  0xbb   :  { %v499_v46 = vmul.f32 0.6931472, %v1388_v44  ;;  %v1390_v54 = vpop.eup %1389  ;;  %v1284_v44 = vpack.c.bf16 %v766_v7, %v762_v39 }
  0xbc   :  { %v285_v60 = vmul.f32 0.6931472, %v1390_v54  ;;  %v769_v54 = vld [vmem:[#allocation5 + $0x2d0] sm:$0xff] }
  0xbd   :  { %1139 = vmatmul.mubr.msk.f32.gmra.mrb[2].mxu0 %vm504_vm0, %v499_v46  ;;  %v761_v46 = vld [vmem:[#allocation5 + $0x290] sm:$0xff] }
  0xbe   :  { %658 = vmatprep.mubr.f32.mxu0 %v1508_v0  ;;  %v1286_v51 = vpack.c.bf16 %v765_v47, %v761_v46 }
  0xc1   :  { %1140 = vmatmul.mubr.msk.f32.vlgmr.msra.gmra.mrb[0].mxu0 %vm504_vm0, %v283_v52  ;;  %v1288_v52 = vpack.c.bf16 %v774_v41, %v770_v48 }
  0xc2   :  { %664 = vmatprep.mubr.f32.mxu0 %v1508_v0  ;;  %1247 = vmatpush1.bf16.msra.mxu0 %v1246_v55  ;;  %v1258_v0 = vpack.c.bf16 %v709_v4, %v705_v3  ;;  %v773_v55 = vld [vmem:[#allocation5 + $0x2f0] sm:$0xff]  ;;  %v788_v3 = vld [vmem:[#allocation5 + $0x368] sm:$0xff]  ;;  %v786_v4 = vld [vmem:[#allocation5 + $0x358] sm:$0xff] }
  0xc3   :  { %1249 = vmatprep.subr.bf16.mxu0 %v1248_v50  ;;  %v1290_v50 = vpack.c.bf16 %v773_v55, %v769_v54  ;;  %v1296_v10 = vpack.c.bf16 %v790_v8, %v786_v4  ;;  %v991_v54 = vld [vmem:[#allocation7 + $0x90] sm:$0xff]  ;;  %v992_v55 = vld [vmem:[#allocation7 + $0x98] sm:$0xff] }
  0xc4   :  { %v1312_v57 = vpack.c.bf16 %v992_v55, %v991_v54  ;;  %v996_v4 = vld [vmem:[#allocation7 + $0xb8] sm:$0xff] }
  0xc5   :  { %1141 = vmatmul.mubr.msk.f32.gmra.mrb[2].mxu0 %vm504_vm0, %v285_v60  ;;  %v782_v60 = vld [vmem:[#allocation5 + $0x338] sm:$0xff] }
  0xc6   :  { %1251 = vmatpush1.bf16.msra.mxu0 %v1250_v33  ;;  %v775_v33 = vld [vmem:[#allocation5 + $0x300] sm:$0xff]  ;;  %v1292_v62 = vpack.c.bf16 %v782_v60, %v778_v58  ;;  %v975_v58 = vld [vmem:[#allocation7 + $0x10] sm:$0xff] }
  0xc7   :  { %1253 = vmatprep.subr.bf16.mxu0 %v1252_v61  ;;  %v779_v61 = vld [vmem:[#allocation5 + $0x320] sm:$0xff] }
  0xc8   :  { %v1230_v63 = vpack.c.bf16 %v779_v61, %v775_v33  ;;  %v993_v33 = vld [vmem:[#allocation7 + $0xa0] sm:$0xff]  ;;  %v994_v61 = vld [vmem:[#allocation7 + $0xa8] sm:$0xff] }
  0xca   :  { %1255 = vmatpush1.bf16.msra.mxu0 %v1254_v56  ;;  %v1294_v56 = vpack.c.bf16 %v781_v45, %v777_v1  ;;  %1231 = vmatpush1.bf16.msra.mxu1 %v1230_v63  ;;  %v1316_v1 = vpack.c.bf16 %v994_v61, %v993_v33  ;;  %v977_v45 = vld [vmem:[#allocation7 + $0x20] sm:$0xff] }
  0xcb   :  { %1257 = vmatprep.subr.bf16.mxu0 %v1256_v2  ;;  %v784_v2 = vld [vmem:[#allocation5 + $0x348] sm:$0xff] }
  0xcc   :  { %v1232_v5 = vpack.c.bf16 %v788_v3, %v784_v2  ;;  %v995_v3 = vld [vmem:[#allocation7 + $0xb0] sm:$0xff] }
  0xcd   :  { %v1320_v8 = vpack.c.bf16 %v996_v4, %v995_v3 }
  0xce   :  { %1259 = vmatpush1.bf16.msra.mxu0 %v1258_v0  ;;  %v783_v0 = vld [vmem:[#allocation5 + $0x340] sm:$0xff]  ;;  %1233 = vmatprep.subr.bf16.mxu1 %v1232_v5 }
  0xcf   :  { %1261 = vmatprep.subr.bf16.mxu0 %v1260_v9  ;;  %v787_v9 = vld [vmem:[#allocation5 + $0x360] sm:$0xff] }
  0xd0   :  { %v1234_v11 = vpack.c.bf16 %v787_v9, %v783_v0  ;;  %v979_v0 = vld [vmem:[#allocation7 + $0x30] sm:$0xff]  ;;  %v980_v9 = vld [vmem:[#allocation7 + $0x38] sm:$0xff] }
  0xd2   :  { %1263 = vmatpush1.bf16.msra.mxu0 %v1262_v49  ;;  %v1298_v49 = vpack.c.bf16 %v789_v12, %v785_v19  ;;  %1235 = vmatpush1.bf16.msra.mxu1 %v1234_v11  ;;  %v998_v11 = vld [vmem:[#allocation7 + $0xc8] sm:$0xff]  ;;  %v1322_v19 = vpack.c.bf16 %v980_v9, %v979_v0 }
  0xd3   :  { %1265 = vmatprep.subr.bf16.mxu0 %v1264_v15  ;;  %v792_v15 = vld [vmem:[#allocation5 + $0x388] sm:$0xff] }
  0xd4   :  { %v1236_v17 = vpack.c.bf16 %v796_v16, %v792_v15  ;;  %v982_v15 = vld [vmem:[#allocation7 + $0x48] sm:$0xff]  ;;  %v999_v16 = vld [vmem:[#allocation7 + $0xd0] sm:$0xff] }
  0xd5   :  { %v1328_v20 = vpack.c.bf16 %v1000_v14, %v999_v16 }
  0xd6   :  { %1267 = vmatpush1.bf16.msra.mxu0 %v1266_v21  ;;  %v791_v21 = vld [vmem:[#allocation5 + $0x380] sm:$0xff]  ;;  %1237 = vmatprep.subr.bf16.mxu1 %v1236_v17 }
  0xd7   :  { %1269 = vmatprep.subr.bf16.mxu0 %v1268_v22  ;;  %v795_v22 = vld [vmem:[#allocation5 + $0x3a0] sm:$0xff] }
  0xd8   :  { %v1238_v24 = vpack.c.bf16 %v795_v22, %v791_v21  ;;  %v983_v21 = vld [vmem:[#allocation7 + $0x50] sm:$0xff]  ;;  %v984_v22 = vld [vmem:[#allocation7 + $0x58] sm:$0xff] }
  0xda   :  { %1271 = vmatpush1.bf16.msra.mxu0 %v1270_v26  ;;  %v1302_v26 = vpack.c.bf16 %v797_v25, %v793_v18  ;;  %1239 = vmatpush1.bf16.msra.mxu1 %v1238_v24  ;;  %v1002_v24 = vld [vmem:[#allocation7 + $0xe8] sm:$0xff]  ;;  %v1330_v18 = vpack.c.bf16 %v984_v22, %v983_v21 }
  0xdb   :  { %1273 = vmatprep.subr.bf16.mxu0 %v1272_v13  ;;  %v800_v13 = vld [vmem:[#allocation5 + $0x3c8] sm:$0xff] }
  0xdc   :  { %v1240_v29 = vpack.c.bf16 %v804_v27, %v800_v13  ;;  %v986_v13 = vld [vmem:[#allocation7 + $0x68] sm:$0xff] }
  0xde   :  { %1275 = vmatpush1.bf16.msra.mxu0 %v1274_v31  ;;  %v799_v31 = vld [vmem:[#allocation5 + $0x3c0] sm:$0xff]  ;;  %1241 = vmatprep.subr.bf16.mxu1 %v1240_v29  ;;  %v1004_v29 = vld [vmem:[#allocation7 + $0xf8] sm:$0xff] }
  0xdf   :  { %1277 = vmatprep.subr.bf16.mxu0 %v1276_v32  ;;  %v803_v32 = vld [vmem:[#allocation5 + $0x3e0] sm:$0xff]  ;;  %v1336_v30 = vpack.c.bf16 %v1004_v29, %v1003_v28 }
  0xe0   :  { %v1242_v35 = vpack.c.bf16 %v803_v32, %v799_v31  ;;  %v987_v31 = vld [vmem:[#allocation7 + $0x70] sm:$0xff]  ;;  %v988_v32 = vld [vmem:[#allocation7 + $0x78] sm:$0xff] }
  0xe2   :  { %1279 = vmatpush1.bf16.msra.mxu0 %v1278_v38  ;;  %v1306_v38 = vpack.c.bf16 %v805_v37, %v801_v36  ;;  %1243 = vmatpush1.bf16.msra.mxu1 %v1242_v35 }
  0xe3   :  { %1281 = vmatprep.subr.bf16.mxu0 %v1280_v40  ;;  %v989_v40 = vld [vmem:[#allocation7 + $0x80] sm:$0xff] }
  0xe4   :  { %v1308_v6 = vpack.c.bf16 %v990_v42, %v989_v40 }
  0xe6   :  { %1283 = vmatpush1.bf16.msra.mxu0 %v1282_v43  ;;  %1309 = vmatprep.subr.bf16.mxu1 %v1308_v6 }
  0xe7   :  { %1285 = vmatprep.subr.bf16.mxu0 %v1284_v44 }
  0xea   :  { %1287 = vmatpush1.bf16.msra.mxu0 %v1286_v51  ;;  %v973_v51 = vld [vmem:[#allocation7] sm:$0xff] }
  0xeb   :  { %1289 = vmatprep.subr.bf16.mxu0 %v1288_v52  ;;  %v974_v52 = vld [vmem:[#allocation7 + $0x8] sm:$0xff] }
  0xee   :  { %1291 = vmatpush1.bf16.msra.mxu0 %v1290_v50  ;;  %v1310_v50 = vpack.c.bf16 %v974_v52, %v973_v51 }
  0xef   :  { %1293 = vmatprep.subr.bf16.mxu0 %v1292_v62  ;;  %v1314_v62 = vpack.c.bf16 %v976_v59, %v975_v58 }
  0xf2   :  { %1295 = vmatpush1.bf16.msra.mxu0 %v1294_v56  ;;  %v978_v56 = vld [vmem:[#allocation7 + $0x28] sm:$0xff] }
  0xf3   :  { %1297 = vmatprep.subr.bf16.mxu0 %v1296_v10  ;;  %v1318_v5 = vpack.c.bf16 %v978_v56, %v977_v45  ;;  %v997_v10 = vld [vmem:[#allocation7 + $0xc0] sm:$0xff] }
  0xf4   :  { %v1324_v12 = vpack.c.bf16 %v998_v11, %v997_v10 }
  0xf6   :  { %1299 = vmatpush1.bf16.msra.mxu0 %v1298_v49  ;;  %v981_v49 = vld [vmem:[#allocation7 + $0x40] sm:$0xff] }
  0xf7   :  { %1301 = vmatprep.subr.bf16.mxu0 %v1300_v23  ;;  %v1326_v17 = vpack.c.bf16 %v982_v15, %v981_v49  ;;  %v1001_v23 = vld [vmem:[#allocation7 + $0xe0] sm:$0xff] }
  0xf8   :  { %v1332_v25 = vpack.c.bf16 %v1002_v24, %v1001_v23 }
  0xfa   :  { %1303 = vmatpush1.bf16.msra.mxu0 %v1302_v26  ;;  %v985_v26 = vld [vmem:[#allocation7 + $0x60] sm:$0xff] }
  0xfb   :  { %1305 = vmatprep.subr.bf16.mxu0 %v1304_v34  ;;  %v1334_v27 = vpack.c.bf16 %v986_v13, %v985_v26  ;;  %v1338_v34 = vpack.c.bf16 %v988_v32, %v987_v31 }
  0xfe   :  { %1307 = vmatpush1.bf16.msra.mxu0 %v1306_v38 }
 0x194   :  { %v660_v39 = vpop.f32.mrb[0].mxu0 }
 0x195   :  { %v671_v7 = vmul.f32 1.442695, %v660_v39  ;;  %v662_v43 = vpop.f32.mrb[1].mxu0 }
 0x196   :  { %v673_v44 = vmul.f32 1.442695, %v662_v43 }
 0x198   :  { %1391 = vpow2.f32 %v673_v44  ;;  %v666_v46 = vpop.f32.mrb[2].mxu0 }
 0x199   :  { %1393 = vpow2.f32 %v671_v7  ;;  %v675_v47 = vmul.f32 1.442695, %v666_v46  ;;  %v668_v48 = vpop.f32.mrb[3].mxu0 }
 0x19a   :  { %v677_v41 = vmul.f32 1.442695, %v668_v48 }
 0x19c   :  { %1395 = vpow2.f32 %v677_v41 }
 0x19d   :  { %1397 = vpow2.f32 %v675_v47 }
 0x1a2   :  { %v1392_v53 = vpop.eup %1391 }
 0x1a3   :  { %v1394_v60 = vpop.eup %1393  ;;  %871 = vmatprep.mubr.f32.mxu1 %v1392_v53  ;;  %948 = vmatprep.mubr.f32.mxu0 %v1392_v53 }
 0x1a4   :  { %872 = vmatmul.mubr.f32.vlgmr.msra.gmra.mrb[0].mxu1 %v1394_v60  ;;  %949 = vmatmul.mubr.f32.vlgmr.msra.gmra.mrb[4].mxu0 %v1394_v60 }
 0x1a5   :  { %1311 = vmatpush3.bf16.msra.mxu1 %v1310_v50 }
 0x1a6   :  { %v1396_v63 = vpop.eup %1395  ;;  %1313 = vmatprep.subr.bf16.mxu1 %v1312_v57 }
 0x1a7   :  { %v1398_v2 = vpop.eup %1397  ;;  %877 = vmatprep.mubr.f32.mxu1 %v1396_v63  ;;  %954 = vmatprep.mubr.f32.mxu0 %v1396_v63 }
 0x1a8   :  { %878 = vmatmul.mubr.f32.gmra.mrb[2].mxu1 %v1398_v2  ;;  %955 = vmatmul.mubr.f32.gmra.mrb[6].mxu0 %v1398_v2 }
 0x1a9   :  { %1315 = vmatpush3.bf16.msra.mxu1 %v1314_v62 }
 0x1aa   :  { %1317 = vmatprep.subr.bf16.mxu1 %v1316_v1 }
 0x1ad   :  { %1319 = vmatpush3.bf16.msra.mxu1 %v1318_v5 }
 0x1ae   :  { %1321 = vmatprep.subr.bf16.mxu1 %v1320_v8 }
 0x1b1   :  { %1323 = vmatpush3.bf16.msra.mxu1 %v1322_v19 }
 0x1b2   :  { %1325 = vmatprep.subr.bf16.mxu1 %v1324_v12 }
 0x1b5   :  { %1327 = vmatpush3.bf16.msra.mxu1 %v1326_v17 }
 0x1b6   :  { %1329 = vmatprep.subr.bf16.mxu1 %v1328_v20 }
 0x1b9   :  { %1331 = vmatpush3.bf16.msra.mxu1 %v1330_v18 }
 0x1ba   :  { %1333 = vmatprep.subr.bf16.mxu1 %v1332_v25 }
 0x1bd   :  { %1335 = vmatpush3.bf16.msra.mxu1 %v1334_v27 }
 0x1be   :  { %1337 = vmatprep.subr.bf16.mxu1 %v1336_v30 }
 0x1c1   :  { %1339 = vmatpush3.bf16.msra.mxu1 %v1338_v34 }
 0x277   :  { %v873_v35 = vpop.f32.mrb[0].mxu1  ;;  %v950_v36 = vpop.f32.mrb[4].mxu0 }
 0x278   :  { %v961_v37 = vmul.f32 %v873_v35, %v873_v35  ;;  %v965_v38 = vmul.f32 %v950_v36, %v950_v36  ;;  %v875_v40 = vpop.f32.mrb[1].mxu1  ;;  %v952_v42 = vpop.f32.mrb[5].mxu0 }
 0x279   :  { %v962_v6 = vmul.f32 %v875_v40, %v875_v40  ;;  %v966_v39 = vmul.f32 %v952_v42, %v952_v42 }
 0x27a   :  { %v969_v7 = vadd.f32 %v965_v38, %v961_v37 }
 0x27b   :  { %v970_v43 = vadd.f32 %v966_v39, %v962_v6  ;;  %v879_v44 = vpop.f32.mrb[2].mxu1  ;;  %v956_v46 = vpop.f32.mrb[6].mxu0 }
 0x27c   :  { %v963_v47 = vmul.f32 %v879_v44, %v879_v44  ;;  %v967_v48 = vmul.f32 %v956_v46, %v956_v46  ;;  %v881_v41 = vpop.f32.mrb[3].mxu1  ;;  %v958_v51 = vpop.f32.mrb[7].mxu0 }
 0x27d   :  { %v964_v52 = vmul.f32 %v881_v41, %v881_v41  ;;  %v968_v54 = vmul.f32 %v958_v51, %v958_v51  ;;  %1069 = vmatprep.mubr.f32.mxu1 %v970_v43 }
 0x27e   :  { %v971_v55 = vadd.f32 %v967_v48, %v963_v47  ;;  %1070 = vmatmul.mubr.f32.vlgmr.msra.gmra.mrb[4].mxu1 %v969_v7 }
 0x27f   :  { %v972_v50 = vadd.f32 %v968_v54, %v964_v52 }
 0x281   :  { %1074 = vmatprep.mubr.f32.mxu1 %v972_v50 }
 0x282   :  { %1075 = vmatmul.mubr.f32.gmra.mrb[6].mxu1 %v971_v55 }
 0x351   :  { %v1174_v53 = vpop.f32.mrb[4].mxu1 }
 0x352   :  { %v1175_v57 = vpop.f32.mrb[5].mxu1 }
 0x353   :  { %v1176_v58 = vadd.f32 %v1175_v57, %v1174_v53 }
 0x355   :  { %1080 = vmax.xlane.f32.xlu0 %v1176_v58  ;;  %v1177_v59 = vpop.f32.mrb[6].mxu1 }
 0x356   :  { %v1178_v60 = vpop.f32.mrb[7].mxu1 }
 0x357   :  { %v1179_v33 = vadd.f32 %v1178_v60, %v1177_v59 }
 0x359   :  { %1082 = vmax.xlane.f32.xlu0 %v1179_v33 }
 0x3e2   :  { %v1081_v61 = vpop.xlane.xlu0 %1080 }
 0x3e3   :  { %v1084_v62 = vsub.f32 %v1176_v58, %v1081_v61 }
 0x3e5   :  { %v1086_v63 = vmul.f32 1.442695, %v1084_v62 }
 0x3e6   :  { %v1083_v1 = vpop.xlane.xlu0 %1082 }
 0x3e7   :  { %v1085_v45 = vsub.f32 %v1179_v33, %v1083_v1  ;;  %1399 = vpow2.f32 %v1086_v63 }
 0x3e9   :  { %v1088_v56 = vmul.f32 1.442695, %v1085_v45 }
 0x3eb   :  { %1401 = vpow2.f32 %v1088_v56 }
 0x3f1   :  { %v1400_v2 = vpop.eup %1399 }
 0x3f2   :  { %1090 = vadd.xlane.f32.xlu1 %v1400_v2 }
 0x3f5   :  { %v1402_v3 = vpop.eup %1401 }
 0x3f6   :  { %1092 = vadd.xlane.f32.xlu1 %v1402_v3 }
 0x47f   :  { %v1091_v4 = vpop.xlane.xlu1 %1090 }
 0x480   :  { %1403 = vlog2.f32 %v1091_v4 }
 0x483   :  { %v1093_v5 = vpop.xlane.xlu1 %1092 }
 0x484   :  { %1405 = vlog2.f32 %v1093_v5 }
 0x48a   :  { %v1404_v8 = vpop.eup %1403 }
 0x48b   :  { %v1095_v0 = vmul.f32 0.6931472, %v1404_v8 }
 0x48d   :  { %v1098_v9 = vsub.f32 %v1084_v62, %v1095_v0 }
 0x48e   :  { %v1406_v10 = vpop.eup %1405 }
 0x48f   :  { %1100 = vst [vmem:[#allocation8] sm:$0xff] %v1098_v9  ;;  %v1097_v11 = vmul.f32 0.6931472, %v1406_v10 }
 0x491   :  { %v1099_v19 = vsub.f32 %v1085_v45, %v1097_v11 }
 0x493   :  { %1101 = vst [vmem:[#allocation8 + $0x8] sm:$0xff] %v1099_v19 }
 0x494   :  { %1484 = shalt.err (!%p1481_p0)
}
 0x495   :  { %s1485_s16 = scalar_lea.hbm %s1728_s5, 256 }
 0x496   :  { %p1486_p1 = scmp.ne.s32.totalorder %s1728_s5, %s1485_s16  ;;  %p1489_p2 = scmp.lt.u32.totalorder %s1485_s16, %s1728_s5 }
 0x498   :  { %p1491_p3 = pnand %p1489_p2, %p1486_p1 }
 0x49a   :  { %1494 = shalt.err (!%p1491_p3)
}
 0x49b   :  { %1113 = dma.vmem_to_hbm [thread:$0]  %s1108_s12, 256, %s1728_s5, [#allocation4], %s1506_s2, %s1506_s2, %s1507_s28  }
 0x49c   :  { %1499 = dma.done.wait [#allocation4], 256  }
 0x49d   :  { %1500 = vsyncadd [#allocation4], 4294967040 }
 0x49e   :  { %1117 = vsyncpa [#allocation3], 1 }
 0x49f   :  { %1118 = vsyncpa [#allocation6], 1 }
 0x4a0   :  { %1119 = vsyncpa [#allocation4], 1 }

</bundles_post_ra>
